<compile_context>
chip_gen: v7x
topology: tpu7x:2x2x1
jax: 0.10.0
libtpu: 0.0.40
codegen_flags: <defaults>
</compile_context>

<pallas_src>
import functools
import warnings

import jax
import jax.numpy as jnp
from jax.experimental import pallas as pl
from jax.experimental.pallas import tpu as pltpu

# If the backend cannot honor buffer donation (e.g. interpret / CPU fallback),
# JAX emits a harmless "donated buffers were not usable" warning; silence it.
warnings.filterwarnings("ignore", message=".*donated buffer.*")
warnings.filterwarnings("ignore", message=".*[Dd]onation.*")

_LANE = 128
_VMEM_LIMIT_BYTES = 32 * 1024 * 1024
# Odd-sized (not a multiple of 128) tensors use a (1, N) lane-tiled view whose
# VMEM footprint is ~8x the data bytes (single used sublane), so keep those
# blocks small; this path is rare (biases / test tensors).
_ODD_BLOCK_BYTES = 512 * 1024


@functools.lru_cache(maxsize=1)
def _target_block_bytes():
    """Per-stream block size, generation aware (bigger on higher-BW chips)."""
    try:
        kind = jax.devices()[0].device_kind.lower()
    except Exception:
        return 2 * 1024 * 1024
    if "v6" in kind or "v7" in kind:
        # ~1.4-3.2 TB/s HBM: 4 MiB blocks amortize the ~0.35us per-step
        # overhead; 3 streams x 2 buffers x 4 MiB = 24 MiB < 64 MiB VMEM (v7x).
        return 4 * 1024 * 1024
    # v5e and unknown chips: 2 MiB blocks (12 MiB double-buffered footprint).
    return 2 * 1024 * 1024


def _make_ema_kernel(mu):
    # Plain Python floats -> weak-typed literals folded into the kernel; the
    # blend is done in f32 and cast back to the storage dtype.
    mu_c = float(mu)
    omm_c = 1.0 - float(mu)

    def kernel(x_ref, shadow_ref, out_ref):
        x = x_ref[...].astype(jnp.float32)
        s = shadow_ref[...].astype(jnp.float32)
        out_ref[...] = (x * mu_c + s * omm_c).astype(out_ref.dtype)

    return kernel


def _ema_pallas(mu, x2d, s2d, block_shape, grid, index_map):
    return pl.pallas_call(
        _make_ema_kernel(mu),
        out_shape=jax.ShapeDtypeStruct(x2d.shape, x2d.dtype),
        grid_spec=pl.GridSpec(
            grid=grid,
            in_specs=[
                pl.BlockSpec(block_shape, index_map),
                pl.BlockSpec(block_shape, index_map),
            ],
            out_specs=pl.BlockSpec(block_shape, index_map),
        ),
        # Shadow is overwritten in place in HBM (it becomes the new average).
        input_output_aliases={1: 0},
        compiler_params=pltpu.CompilerParams(
            dimension_semantics=("parallel",) * len(grid),  # v7x: 2 TCs
            vmem_limit_bytes=_VMEM_LIMIT_BYTES,
        ),
    )(x2d, s2d)


def _pick_tile_rows(rows, dtype, target_bytes):
    itemsize = jnp.dtype(dtype).itemsize
    target = max(8, (target_bytes // (_LANE * itemsize)) // 8 * 8)
    return rows if rows <= target else target


def _pick_tile_cols(total, dtype, target_bytes):
    itemsize = jnp.dtype(dtype).itemsize
    target = max(_LANE, (target_bytes // itemsize) // _LANE * _LANE)
    return total if total <= target else target


@functools.partial(jax.jit, static_argnums=(0,), donate_argnums=(2,))
def ema_forward(mu, x, shadow):
    """mu * x + (1 - mu) * shadow, via a Pallas kernel.

    `shadow` is donated: its HBM buffer is reused for the result (callers must
    not touch the old shadow array after the call — EMA replaces it anyway).
    """
    assert x.shape == shadow.shape
    orig_shape = x.shape
    dtype = x.dtype
    if shadow.dtype != dtype:
        shadow = shadow.astype(dtype)
    total = x.size
    mu = float(mu)

    if total % _LANE == 0:
        # Lane-dense (rows, 128) slab; ragged last row-block handled by Pallas
        # masking (no padding, no extra HBM passes).
        rows = total // _LANE
        x2d = x.reshape(rows, _LANE)
        s2d = shadow.reshape(rows, _LANE)
        tile_rows = _pick_tile_rows(rows, dtype, _target_block_bytes())
        out2d = _ema_pallas(
            mu, x2d, s2d,
            block_shape=(tile_rows, _LANE),
            grid=(pl.cdiv(rows, tile_rows),),
            index_map=lambda i: (i, 0),
        )
        return out2d.reshape(orig_shape)

    # Odd total: (1, total) view tiled along the lane dim; ragged last block is
    # masked by Pallas — still no padding and no extra HBM passes.
    x2d = x.reshape(1, total)
    s2d = shadow.reshape(1, total)
    tile_cols = _pick_tile_cols(total, dtype, _ODD_BLOCK_BYTES)
    out2d = _ema_pallas(
        mu, x2d, s2d,
        block_shape=(1, tile_cols),
        grid=(pl.cdiv(total, tile_cols),),
        index_map=lambda i: (0, i),
    )
    return out2d.reshape(orig_shape)


class EMA:
    """JAX/Pallas port of the PyTorch EMA module (functional shadow state)."""

    def __init__(self, mu):
        self.mu = float(mu)
        self.shadow = {}
        self.default = {}

    def register_ema(self, name, val):
        self.shadow[name] = jnp.array(val)

    def register_default(self, name, val):
        self.default[name] = jnp.array(val)

    def get_ema(self, name):
        assert name in self.shadow
        return jnp.array(self.shadow[name])

    def get_default(self, name):
        assert name in self.default
        return jnp.array(self.default[name])

    def __call__(self, name, x):
        assert name in self.shadow
        new_average = ema_forward(self.mu, x, self.shadow[name])
        # The old shadow buffer was donated to the kernel (in-place HBM
        # update); it must never be read again — it is replaced right here.
        self.shadow[name] = new_average
        return new_average

    # PyTorch-style alias.
    forward = __call__

    def update_batch(self, inputs):
        """EMA-update many named tensors with a single kernel launch.

        Packs all inputs/shadows into one flat slab so dispatch + pipeline
        warm-up cost is paid once instead of once per (typically tiny) tensor.
        """
        names = list(inputs)
        assert names, "update_batch needs at least one tensor"
        for n in names:
            assert n in self.shadow
        dtype = inputs[names[0]].dtype
        sizes = [int(inputs[n].size) for n in names]
        x_flat = jnp.concatenate(
            [inputs[n].reshape(-1).astype(dtype) for n in names])
        s_flat = jnp.concatenate(
            [self.shadow[n].reshape(-1).astype(dtype) for n in names])
        out_flat = ema_forward(self.mu, x_flat, s_flat)
        # TODO(synk): keep the shadow permanently packed as one lane-dense slab
        # (slice lazily in get_ema) to avoid re-concatenating it every step.
        results, off = {}, 0
        for n, sz in zip(names, sizes):
            r = out_flat[off:off + sz].reshape(inputs[n].shape)
            self.shadow[n] = r
            results[n] = r
            off += sz
        return results


if __name__ == "__main__":
    key = jax.random.PRNGKey(0)
    k1, k2, k3, k4, k5, k6 = jax.random.split(key, 6)

    mu = 0.9
    ema = EMA(mu)

    # Small NCHW tensor; total = 2048 = 16 * 128 -> lane-dense fast path.
    x = jax.random.normal(k1, (2, 4, 16, 16), dtype=jnp.float32)
    shadow_init = jax.random.normal(k2, (2, 4, 16, 16), dtype=jnp.float32)
    ema.register_ema("param", shadow_init)
    ema.register_default("param", shadow_init)

    out1 = jax.block_until_ready(ema("param", x))
    ref1 = mu * x + (1.0 - mu) * shadow_init
    assert out1.shape == x.shape and out1.dtype == x.dtype
    assert jnp.allclose(out1, ref1, atol=1e-6, rtol=1e-6)
    assert jnp.allclose(ema.get_ema("param"), ref1, atol=1e-6, rtol=1e-6)
    assert jnp.allclose(ema.get_default("param"), shadow_init, atol=1e-6, rtol=1e-6)

    # Second step: shadow state chains correctly (old shadow buffer donated).
    x2 = jax.random.normal(k3, (2, 4, 16, 16), dtype=jnp.float32)
    out2 = jax.block_until_ready(ema("param", x2))
    ref2 = mu * x2 + (1.0 - mu) * ref1
    assert jnp.allclose(out2, ref2, atol=1e-6, rtol=1e-6)

    # Odd-sized tensor (105 elements): pad-free lane-tiled (1, N) path.
    y = jax.random.normal(k4, (3, 5, 7), dtype=jnp.float32)
    ema.register_ema("odd", jnp.zeros_like(y))
    out3 = jax.block_until_ready(ema("odd", y))
    ref3 = mu * y
    assert out3.shape == y.shape
    assert jnp.allclose(out3, ref3, atol=1e-6, rtol=1e-6)

    # Batched update: many small tensors -> one packed slab, one launch.
    sa = jnp.ones((4, 8, 8), dtype=jnp.float32)
    sb = jnp.full((33,), 2.0, dtype=jnp.float32)
    ema.register_ema("wa", sa)
    ema.register_ema("wb", sb)
    xa = jax.random.normal(k5, (4, 8, 8), dtype=jnp.float32)
    xb = jax.random.normal(k6, (33,), dtype=jnp.float32)
    outs = ema.update_batch({"wa": xa, "wb": xb})
    jax.block_until_ready(outs["wb"])
    assert jnp.allclose(outs["wa"], mu * xa + (1.0 - mu) * sa, atol=1e-6, rtol=1e-6)
    assert jnp.allclose(outs["wb"], mu * xb + (1.0 - mu) * sb, atol=1e-6, rtol=1e-6)
    assert jnp.allclose(ema.get_ema("wa"), outs["wa"], atol=1e-6, rtol=1e-6)

    print("KERNEL_OK")
</pallas_src>

<mosaic_0001>
module attributes {stable_mosaic.version = 11 : i64} {
  func.func @kernel(%arg0: i32, %arg1: memref<16x128xf32, #tpu.memory_space<vmem>>, %arg2: memref<16x128xf32, #tpu.memory_space<vmem>>, %arg3: memref<16x128xf32, #tpu.memory_space<vmem>>) attributes {dimension_semantics = [#tpu.dimension_semantics<parallel>], iteration_bounds = array<i64: 1>, scalar_prefetch = 0 : i64, scratch_operands = 0 : i64, tpu.core_type = #tpu.core_type<tc>, window_params = [{transform_indices = @transform_0, window_bounds = array<i64: 16, 128>}, {transform_indices = @transform_1, window_bounds = array<i64: 16, 128>}, {transform_indices = @transform_2, window_bounds = array<i64: 16, 128>}]} {
    %c0 = arith.constant 0 : index
    %c0_0 = arith.constant 0 : index
    %0 = vector.load %arg1[%c0, %c0_0] : memref<16x128xf32, #tpu.memory_space<vmem>>, vector<16x128xf32>
    %c0_1 = arith.constant 0 : index
    %c0_2 = arith.constant 0 : index
    %1 = vector.load %arg2[%c0_1, %c0_2] : memref<16x128xf32, #tpu.memory_space<vmem>>, vector<16x128xf32>
    %cst = arith.constant 0.899999976 : f32
    %2 = vector.broadcast %cst : f32 to vector<16x128xf32>
    %3 = arith.mulf %0, %2 : vector<16x128xf32>
    %cst_3 = arith.constant 1.000000e-01 : f32
    %4 = vector.broadcast %cst_3 : f32 to vector<16x128xf32>
    %5 = arith.mulf %1, %4 : vector<16x128xf32>
    %6 = arith.addf %3, %5 : vector<16x128xf32>
    %c0_4 = arith.constant 0 : index
    %c0_5 = arith.constant 0 : index
    %7 = vector.load %arg3[%c0_4, %c0_5] : memref<16x128xf32, #tpu.memory_space<vmem>>, vector<16x128xf32>
    tpu.vector_store %arg3[%c0_4, %c0_5], %6 {strides = array<i32>} : memref<16x128xf32, #tpu.memory_space<vmem>>, vector<16x128xf32>,
    return
  }
  func.func @transform_0(%arg0: i32) -> (i32, i32) {
    %c0_i32 = arith.constant 0 : i32
    %c0_i32_0 = arith.constant 0 : i32
    return %arg0, %c0_i32 : i32, i32
  }
  func.func @transform_1(%arg0: i32) -> (i32, i32) {
    %c0_i32 = arith.constant 0 : i32
    %c0_i32_0 = arith.constant 0 : i32
    return %arg0, %c0_i32 : i32, i32
  }
  func.func @transform_2(%arg0: i32) -> (i32, i32) {
    %c0_i32 = arith.constant 0 : i32
    %c0_i32_0 = arith.constant 0 : i32
    return %arg0, %c0_i32 : i32, i32
  }
}

</mosaic_0001>

<bundles_post_ra>
// kernel: ema_forward.1
= control target key start
LH: loop header
LB: loop body
LE: loop exit
PB: predicated region body
PF: predicated region fallthrough
CT: control target
= control target key end

     0   :  { %s60_s0 = inlined_call_operand.vmem [shape: f32[16,128], index: 0, kind: input, shape index: {}]   ;;  %s61_s1 = inlined_call_operand.vmem [shape: f32[16,128], index: 1, kind: input, shape index: {}, may-alias: {1,2}]   ;;  %s62_s2 = inlined_call_operand.vmem [shape: f32[16,128], index: 2, kind: output, shape index: {}, may-alias: {1,2}]  }
   0x1   :  { %v11_v0 = vld [vmem:[%s60_s0] sm:$0xff]  ;;  %v12_v2 = vld [vmem:[%s60_s0 + $0x8] sm:$0xff] }
   0x2   :  { %v13_v1 = vld [vmem:[%s61_s1] sm:$0xff]  ;;  %v15_v3 = vmul.f32 0.9, %v11_v0  ;;  %v14_v5 = vld [vmem:[%s61_s1 + $0x8] sm:$0xff]  ;;  %v16_v6 = vmul.f32 0.9, %v12_v2 }
   0x3   :  { %v17_v4 = vmul.f32 0.1, %v13_v1  ;;  %v18_v7 = vmul.f32 0.1, %v14_v5 }
   0x5   :  { %v19_v8 = vadd.f32 %v17_v4, %v15_v3  ;;  %v20_v9 = vadd.f32 %v18_v7, %v16_v6 }
   0x7   :  { %21 = vst [vmem:[%s62_s2] sm:$0xff] %v19_v8  ;;  %22 = vst [vmem:[%s62_s2 + $0x8] sm:$0xff] %v20_v9 }

</bundles_post_ra>
